<compile_context>
chip_gen: v7x
topology: tpu7x:2x2x1
jax: 0.10.0
libtpu: 0.0.40
codegen_flags: <defaults>
</compile_context>

<pallas_src>
import math

import jax
import jax.numpy as jnp
from jax.experimental import pallas as pl
from jax.experimental.pallas import tpu as pltpu


H1, H2, H3 = 64, 32, 16  # hidden sizes fixed by the torch module


def critic_kernel(saT_ref, w0_ref, w21_ref, w3a_ref, w3b_ref, misc_ref, out_ref):
    f32 = jnp.float32
    cdt = w0_ref.dtype  # MXU operand dtype (bf16 fast path, f32 exact path)

    # Raw f32 activations arrive; cast to the MXU operand dtype in-kernel (idle VPU slot).
    saT = saT_ref[...].astype(cdt)                                 # (n_in + n_act, tb)

    # Packed f32 operand: [b1(64); b2_2(32); b2_1(32); b3(16); w4(16); b4(1)] = (161, 1).
    b0  = misc_ref[0:H1 + H2, :]                                   # (96, 1)
    b21 = misc_ref[H1 + H2:H1 + 2 * H2, :]                         # (32, 1)
    b3  = misc_ref[H1 + 2 * H2:H1 + 2 * H2 + H3, :]                # (16, 1)
    w4  = misc_ref[H1 + 2 * H2 + H3:H1 + 2 * H2 + 2 * H3, :]       # (16, 1)
    b4  = misc_ref[H1 + 2 * H2 + 2 * H3:H1 + 2 * H2 + 2 * H3 + 1, :]  # (1, 1)

    # [h1ᵀ ; h2_2ᵀ] = relu(blockdiag(W1ᵀ, W2_2ᵀ) @ [state|action]ᵀ + [b1; b2_2]) (96, tb)
    h0 = jnp.maximum(
        jnp.dot(w0_ref[...], saT, preferred_element_type=f32) + b0, 0.0)
    h1T = h0[:H1, :].astype(cdt)      # (64, tb)  fc1 output    (sublane-aligned slice)
    h22T = h0[H1:, :].astype(cdt)     # (32, tb)  fc2_2 output

    # h2_1ᵀ = relu(W2_1ᵀ @ h1ᵀ + b2_1)                                          (32, tb)
    h21T = jnp.maximum(
        jnp.dot(w21_ref[...], h1T, preferred_element_type=f32) + b21, 0.0)

    # h3ᵀ = relu(W3ᵀ @ cat(h2_1, h2_2)ᵀ + b3)
    #     = relu(W3[:32]ᵀ @ h2_1ᵀ + W3[32:]ᵀ @ h2_2ᵀ + b3)                       (16, tb)
    h3T = jnp.maximum(
        jnp.dot(w3a_ref[...], h21T.astype(cdt), preferred_element_type=f32)
        + jnp.dot(w3b_ref[...], h22T, preferred_element_type=f32)
        + b3, 0.0)

    # qᵀ = W4ᵀ @ h3ᵀ + b4 with M=1: VPU multiply + sublane reduce; lane-dense (1, tb) out.
    out_ref[...] = jnp.sum(h3T * w4, axis=0, keepdims=True) + b4


def prepare_params(params, *, use_bf16=True):
    """One-time weight packing (run once, outside the per-step hot path)."""
    (w1, b1, w21, b21, w22, b22, w3, b3, w4, b4) = params
    n_in, n_act = w1.shape[0], w22.shape[0]
    f32 = jnp.float32
    cdt = jnp.bfloat16 if use_bf16 else f32

    # Feature-major block-diagonal fusion of fc1 / fc2_2: (96, n_in + n_act).
    w0T = jnp.zeros((H1 + H2, n_in + n_act), f32)
    w0T = w0T.at[:H1, :n_in].set(w1.T).at[H1:, n_in:].set(w22.T)
    w21T = w21.T                      # (32, 64)
    w3aT = w3[:H2, :].T               # (16, 32)  consumes h2_1
    w3bT = w3[H2:, :].T               # (16, 32)  consumes h2_2
    misc = jnp.concatenate(
        [b1, b22, b21, b3, w4.reshape(-1), b4]).reshape(-1, 1).astype(f32)  # (161, 1)
    return (w0T.astype(cdt), w21T.astype(cdt), w3aT.astype(cdt),
            w3bT.astype(cdt), misc)


def _round_up(x, m):
    return m * ((x + m - 1) // m)


def critic_forward(state, action, prepared, *, block_b=2048):
    """state: (B, n_in) f32, action: (B, n_action) f32 -> q_value: (B, 1) f32."""
    w0T, w21T, w3aT, w3bT, misc = prepared
    B = state.shape[0]
    n_feat = state.shape[1] + action.shape[1]
    f32 = jnp.float32

    # Batch tile: lane-aligned (multiple of 128), capped by block_b, and split into
    # >=2 grid steps whenever the batch spans more than one minimal tile so the
    # "parallel" grid axis can feed both v7x TensorCores.
    block_b = max(128, _round_up(block_b, 128))
    bp_min = _round_up(B, 128)
    if bp_min <= block_b:
        tb = _round_up(bp_min // 2, 128) if bp_min >= 256 else bp_min
    else:
        tb = block_b
    bp = _round_up(B, tb)

    # Feature-major input (n_feat, bp), still f32 — the bf16 cast happens in-kernel.
    saT = jnp.concatenate([state.T, action.T], axis=0)
    if bp != B:
        saT = jnp.pad(saT, ((0, 0), (0, bp - B)))

    def resident(a):  # whole array VMEM-resident; same block every grid step
        return pl.BlockSpec(a.shape, lambda i: (0,) * a.ndim)

    qT = pl.pallas_call(
        critic_kernel,
        out_shape=jax.ShapeDtypeStruct((1, bp), f32),
        grid=(bp // tb,),
        in_specs=[
            pl.BlockSpec((n_feat, tb), lambda i: (0, i)),   # batch-tiled (lane) input
            resident(w0T), resident(w21T), resident(w3aT), resident(w3bT),
            resident(misc),
        ],
        out_specs=pl.BlockSpec((1, tb), lambda i: (0, i)),  # lane-dense q row
        compiler_params=pltpu.CompilerParams(
            dimension_semantics=("parallel",)),
    )(saT, w0T, w21T, w3aT, w3bT, misc)

    return qT[0, :B][:, None]


def init_params(key, n_in, n_action):
    """Deterministic init mimicking nn.Linear default (uniform +-1/sqrt(fan_in)).

    Weights are stored as (in_features, out_features).
    """
    def linear(key, fan_in, fan_out):
        kw, kb = jax.random.split(key)
        bound = 1.0 / math.sqrt(fan_in)
        w = jax.random.uniform(kw, (fan_in, fan_out), jnp.float32, -bound, bound)
        b = jax.random.uniform(kb, (fan_out,), jnp.float32, -bound, bound)
        return w, b

    k1, k2, k3, k4, k5 = jax.random.split(key, 5)
    w1, b1 = linear(k1, n_in, H1)
    w21, b21 = linear(k2, H1, H2)
    w22, b22 = linear(k3, n_action, H2)
    w3, b3 = linear(k4, H1, H3)
    w4, b4 = linear(k5, H3, 1)
    return (w1, b1, w21, b21, w22, b22, w3, b3, w4, b4)


def critic_reference(state, action, params):
    (w1, b1, w21, b21, w22, b22, w3, b3, w4, b4) = params
    h1 = jax.nn.relu(state @ w1 + b1)
    h2_1 = jax.nn.relu(h1 @ w21 + b21)
    h2_2 = jax.nn.relu(action @ w22 + b22)
    h2 = jnp.concatenate([h2_1, h2_2], axis=1)
    h3 = jax.nn.relu(h2 @ w3 + b3)
    return h3 @ w4 + b4


if __name__ == "__main__":
    n_in, n_action = 16, 4

    key = jax.random.PRNGKey(0)
    kp, ks, ka = jax.random.split(key, 3)
    params = init_params(kp, n_in, n_action)

    prep_f32 = prepare_params(params, use_bf16=False)
    prep_bf16 = prepare_params(params, use_bf16=True)

    # Small batch (shape the module implies), exact f32 path.
    B = 8
    state = jax.random.normal(ks, (B, n_in), jnp.float32)
    action = jax.random.normal(ka, (B, n_action), jnp.float32)
    q_ref = critic_reference(state, action, params)

    q_f32 = jax.block_until_ready(critic_forward(state, action, prep_f32))
    assert q_f32.shape == (B, 1)
    assert jnp.allclose(q_f32, q_ref, atol=1e-4, rtol=1e-4), (q_f32, q_ref)

    # bf16 MXU-operand fast path (f32 accumulation) -- bf16-level tolerance.
    q_bf16 = jax.block_until_ready(critic_forward(state, action, prep_bf16))
    assert q_bf16.shape == (B, 1)
    assert jnp.allclose(q_bf16, q_ref, atol=3e-2, rtol=3e-2), (q_bf16, q_ref)

    # Larger, non-multiple batch: >=2-step "parallel" grid + lane padding.
    B2 = 500
    ks2, ka2 = jax.random.split(jax.random.PRNGKey(1))
    state2 = jax.random.normal(ks2, (B2, n_in), jnp.float32)
    action2 = jax.random.normal(ka2, (B2, n_action), jnp.float32)
    q2_ref = critic_reference(state2, action2, params)

    q2 = jax.block_until_ready(critic_forward(state2, action2, prep_f32))
    assert q2.shape == (B2, 1)
    assert jnp.allclose(q2, q2_ref, atol=1e-4, rtol=1e-4), "multi-tile mismatch"

    # Explicit small tile cap -> longer grid on the bf16 fast path, still accurate.
    q2b = jax.block_until_ready(
        critic_forward(state2, action2, prep_bf16, block_b=128))
    assert q2b.shape == (B2, 1)
    assert jnp.allclose(q2b, q2_ref, atol=3e-2, rtol=3e-2), "small-tile mismatch"

    print("KERNEL_OK")
</pallas_src>

<mosaic_0001>
module attributes {stable_mosaic.version = 11 : i64} {
  func.func @critic_kernel(%arg0: i32, %arg1: memref<20x128xf32, #tpu.memory_space<vmem>>, %arg2: memref<96x20xf32, #tpu.memory_space<vmem>>, %arg3: memref<32x64xf32, #tpu.memory_space<vmem>>, %arg4: memref<16x32xf32, #tpu.memory_space<vmem>>, %arg5: memref<16x32xf32, #tpu.memory_space<vmem>>, %arg6: memref<161x1xf32, #tpu.memory_space<vmem>>, %arg7: memref<1x128xf32, #tpu.memory_space<vmem>>) attributes {dimension_semantics = [#tpu.dimension_semantics<parallel>], iteration_bounds = array<i64: 1>, scalar_prefetch = 0 : i64, scratch_operands = 0 : i64, tpu.core_type = #tpu.core_type<tc>, window_params = [{transform_indices = @transform_0, window_bounds = array<i64: 20, 128>}, {pipeline_mode = #tpu.pipeline_mode<synchronous>, transform_indices = @transform_1, window_bounds = array<i64: 96, 20>}, {pipeline_mode = #tpu.pipeline_mode<synchronous>, transform_indices = @transform_2, window_bounds = array<i64: 32, 64>}, {pipeline_mode = #tpu.pipeline_mode<synchronous>, transform_indices = @transform_3, window_bounds = array<i64: 16, 32>}, {pipeline_mode = #tpu.pipeline_mode<synchronous>, transform_indices = @transform_4, window_bounds = array<i64: 16, 32>}, {pipeline_mode = #tpu.pipeline_mode<synchronous>, transform_indices = @transform_5, window_bounds = array<i64: 161, 1>}, {transform_indices = @transform_6, window_bounds = array<i64: 1, 128>}]} {
    %c0 = arith.constant 0 : index
    %c0_0 = arith.constant 0 : index
    %0 = vector.load %arg1[%c0, %c0_0] : memref<20x128xf32, #tpu.memory_space<vmem>>, vector<20x128xf32>
    %c0_1 = arith.constant 0 : index
    %c0_2 = arith.constant 0 : index
    %1 = vector.load %arg6[%c0_1, %c0_2] : memref<161x1xf32, #tpu.memory_space<vmem>>, vector<96x1xf32>
    %c96 = arith.constant 96 : index
    %c0_3 = arith.constant 0 : index
    %2 = vector.load %arg6[%c96, %c0_3] : memref<161x1xf32, #tpu.memory_space<vmem>>, vector<32x1xf32>
    %c128 = arith.constant 128 : index
    %c0_4 = arith.constant 0 : index
    %3 = vector.load %arg6[%c128, %c0_4] : memref<161x1xf32, #tpu.memory_space<vmem>>, vector<16x1xf32>
    %c144 = arith.constant 144 : index
    %c0_5 = arith.constant 0 : index
    %4 = vector.load %arg6[%c144, %c0_5] : memref<161x1xf32, #tpu.memory_space<vmem>>, vector<16x1xf32>
    %c160 = arith.constant 160 : index
    %c0_6 = arith.constant 0 : index
    %5 = vector.load %arg6[%c160, %c0_6] : memref<161x1xf32, #tpu.memory_space<vmem>>, vector<1x1xf32>
    %c0_7 = arith.constant 0 : index
    %c0_8 = arith.constant 0 : index
    %6 = vector.load %arg2[%c0_7, %c0_8] : memref<96x20xf32, #tpu.memory_space<vmem>>, vector<96x20xf32>
    %cst = arith.constant dense<0.000000e+00> : vector<96x128xf32>
    %7 = tpu.matmul %6, %0, %cst {dimension_numbers = #tpu.dot_dimension_numbers<[1], [0], [0], [1], [0, 0, 1, 1], [], []>} : vector<96x20xf32>, vector<20x128xf32>, vector<96x128xf32> -> vector<96x128xf32>
    %8 = vector.broadcast %1 : vector<96x1xf32> to vector<96x128xf32>
    %9 = arith.addf %7, %8 : vector<96x128xf32>
    %cst_9 = arith.constant 0.000000e+00 : f32
    %10 = vector.broadcast %cst_9 : f32 to vector<96x128xf32>
    %11 = arith.maximumf %9, %10 : vector<96x128xf32>
    %12 = vector.extract_strided_slice %11 {offsets = [0, 0], sizes = [64, 128], strides = [1, 1]} : vector<96x128xf32> to vector<64x128xf32>
    %13 = vector.extract_strided_slice %11 {offsets = [64, 0], sizes = [32, 128], strides = [1, 1]} : vector<96x128xf32> to vector<32x128xf32>
    %c0_10 = arith.constant 0 : index
    %c0_11 = arith.constant 0 : index
    %14 = vector.load %arg3[%c0_10, %c0_11] : memref<32x64xf32, #tpu.memory_space<vmem>>, vector<32x64xf32>
    %cst_12 = arith.constant dense<0.000000e+00> : vector<32x128xf32>
    %15 = tpu.matmul %14, %12, %cst_12 {dimension_numbers = #tpu.dot_dimension_numbers<[1], [0], [0], [1], [0, 0, 1, 1], [], []>} : vector<32x64xf32>, vector<64x128xf32>, vector<32x128xf32> -> vector<32x128xf32>
    %16 = vector.broadcast %2 : vector<32x1xf32> to vector<32x128xf32>
    %17 = arith.addf %15, %16 : vector<32x128xf32>
    %cst_13 = arith.constant 0.000000e+00 : f32
    %18 = vector.broadcast %cst_13 : f32 to vector<32x128xf32>
    %19 = arith.maximumf %17, %18 : vector<32x128xf32>
    %c0_14 = arith.constant 0 : index
    %c0_15 = arith.constant 0 : index
    %20 = vector.load %arg4[%c0_14, %c0_15] : memref<16x32xf32, #tpu.memory_space<vmem>>, vector<16x32xf32>
    %cst_16 = arith.constant dense<0.000000e+00> : vector<16x128xf32>
    %21 = tpu.matmul %20, %19, %cst_16 {dimension_numbers = #tpu.dot_dimension_numbers<[1], [0], [0], [1], [0, 0, 1, 1], [], []>} : vector<16x32xf32>, vector<32x128xf32>, vector<16x128xf32> -> vector<16x128xf32>
    %c0_17 = arith.constant 0 : index
    %c0_18 = arith.constant 0 : index
    %22 = vector.load %arg5[%c0_17, %c0_18] : memref<16x32xf32, #tpu.memory_space<vmem>>, vector<16x32xf32>
    %cst_19 = arith.constant dense<0.000000e+00> : vector<16x128xf32>
    %23 = tpu.matmul %22, %13, %cst_19 {dimension_numbers = #tpu.dot_dimension_numbers<[1], [0], [0], [1], [0, 0, 1, 1], [], []>} : vector<16x32xf32>, vector<32x128xf32>, vector<16x128xf32> -> vector<16x128xf32>
    %24 = arith.addf %21, %23 : vector<16x128xf32>
    %25 = vector.broadcast %3 : vector<16x1xf32> to vector<16x128xf32>
    %26 = arith.addf %24, %25 : vector<16x128xf32>
    %cst_20 = arith.constant 0.000000e+00 : f32
    %27 = vector.broadcast %cst_20 : f32 to vector<16x128xf32>
    %28 = arith.maximumf %26, %27 : vector<16x128xf32>
    %29 = vector.broadcast %4 : vector<16x1xf32> to vector<16x128xf32>
    %30 = arith.mulf %28, %29 : vector<16x128xf32>
    %cst_21 = arith.constant dense<0.000000e+00> : vector<128xf32>
    %31 = vector.multi_reduction <add>, %30, %cst_21 [0] : vector<16x128xf32> to vector<128xf32>
    %32 = vector.shape_cast %31 : vector<128xf32> to vector<1x128xf32>
    %33 = vector.broadcast %5 : vector<1x1xf32> to vector<1x128xf32>
    %34 = arith.addf %32, %33 : vector<1x128xf32>
    %c0_22 = arith.constant 0 : index
    %c0_23 = arith.constant 0 : index
    %35 = vector.load %arg7[%c0_22, %c0_23] : memref<1x128xf32, #tpu.memory_space<vmem>>, vector<1x128xf32>
    tpu.vector_store %arg7[%c0_22, %c0_23], %34 {strides = array<i32>} : memref<1x128xf32, #tpu.memory_space<vmem>>, vector<1x128xf32>,
    return
  }
  func.func @transform_0(%arg0: i32) -> (i32, i32) {
    %c0_i32 = arith.constant 0 : i32
    %c0_i32_0 = arith.constant 0 : i32
    return %c0_i32, %arg0 : i32, i32
  }
  func.func @transform_1(%arg0: i32) -> (i32, i32) {
    %c0_i32 = arith.constant 0 : i32
    %c0_i32_0 = arith.constant 0 : i32
    %c0_i32_1 = arith.constant 0 : i32
    return %c0_i32, %c0_i32_0 : i32, i32
  }
  func.func @transform_2(%arg0: i32) -> (i32, i32) {
    %c0_i32 = arith.constant 0 : i32
    %c0_i32_0 = arith.constant 0 : i32
    %c0_i32_1 = arith.constant 0 : i32
    return %c0_i32, %c0_i32_0 : i32, i32
  }
  func.func @transform_3(%arg0: i32) -> (i32, i32) {
    %c0_i32 = arith.constant 0 : i32
    %c0_i32_0 = arith.constant 0 : i32
    %c0_i32_1 = arith.constant 0 : i32
    return %c0_i32, %c0_i32_0 : i32, i32
  }
  func.func @transform_4(%arg0: i32) -> (i32, i32) {
    %c0_i32 = arith.constant 0 : i32
    %c0_i32_0 = arith.constant 0 : i32
    %c0_i32_1 = arith.constant 0 : i32
    return %c0_i32, %c0_i32_0 : i32, i32
  }
  func.func @transform_5(%arg0: i32) -> (i32, i32) {
    %c0_i32 = arith.constant 0 : i32
    %c0_i32_0 = arith.constant 0 : i32
    %c0_i32_1 = arith.constant 0 : i32
    return %c0_i32, %c0_i32_0 : i32, i32
  }
  func.func @transform_6(%arg0: i32) -> (i32, i32) {
    %c0_i32 = arith.constant 0 : i32
    %c0_i32_0 = arith.constant 0 : i32
    return %c0_i32, %arg0 : i32, i32
  }
}

</mosaic_0001>

<bundles_post_ra>
// kernel: tpu_custom_call.1
= control target key start
LH: loop header
LB: loop body
LE: loop exit
PB: predicated region body
PF: predicated region fallthrough
CT: control target
= control target key end

     0   :  { %vm120_vm0 = vcmask 162816   ;;  %vm157_vm1 = vcmask 1043456   ;;  %v839_v5 = vmov 0   ;;  %s1040_s0 = inlined_call_operand.vmem [shape: f32[20,128], index: 0, kind: input, shape index: {}]   ;;  %s1041_s1 = inlined_call_operand.vmem [shape: f32[96,20], index: 1, kind: input, shape index: {}]   ;;  %s1042_s2 = inlined_call_operand.vmem [shape: f32[32,64], index: 2, kind: input, shape index: {}]   ;;  %s1043_s3 = inlined_call_operand.vmem [shape: f32[16,32], index: 3, kind: input, shape index: {}]   ;;  %s1044_s4 = inlined_call_operand.vmem [shape: f32[16,32], index: 4, kind: input, shape index: {}]   ;;  %s1045_s5 = inlined_call_operand.vmem [shape: f32[161,1], index: 5, kind: input, shape index: {}]   ;;  %s1046_s6 = inlined_call_operand.hbm [shape: f32[1,128], index: 6, kind: output, shape index: {}]  }
   0x1   :  { %v24_v0 = vld [vmem:[%s1040_s0] sm:$0xff]  ;;  %v25_v1 = vld [vmem:[%s1040_s0 + $0x8] sm:$0xff]  ;;  %v26_v4 = vld [vmem:[%s1040_s0 + $0x10] sm:$0xf]  ;;  %813 = vset.pattern.permute.xlu0 %v839_v5  ;;  %814 = vset.pattern.permute.xlu1 %v839_v5 }
   0x2   :  { %v773_v2 = vpack.c.bf16 %v25_v1, %v24_v0  ;;  %v48_v3 = vld [vmem:[%s1041_s1] sm:$0xff]  ;;  %v29_v7 = vld [vmem:[%s1045_s5 + $0x10] sm:$0xff]  ;;  %v49_v8 = vld [vmem:[%s1041_s1 + $0x8] sm:$0xff] }
   0x3   :  { %711 = vmatprep.mubr.msk.f32.mxu0 %vm120_vm0, %v48_v3  ;;  %v27_v6 = vld [vmem:[%s1045_s5] sm:$0xff]  ;;  %72 = vperm.xlu1 %814, %v29_v7   ;;  %v50_v9 = vld [vmem:[%s1041_s1 + $0x10] sm:$0xff]  ;;  %v28_v10 = vld [vmem:[%s1045_s5 + $0x8] sm:$0xff] }
   0x4   :  { %774 = vmatprep.subr.bf16.mxu0 %v773_v2  ;;  %62 = vperm.xlu0 %813, %v27_v6   ;;  %v30_v11 = vld [vmem:[%s1045_s5 + $0x18] sm:$0xff]  ;;  %v52_v13 = vld [vmem:[%s1041_s1 + $0x20] sm:$0xff]  ;;  %v32_v15 = vld [vmem:[%s1045_s5 + $0x28] sm:$0xff] }
   0x5   :  { %776 = vmatpush3.bf16.msra.mxu0 %v773_v2  ;;  %v51_v12 = vld [vmem:[%s1041_s1 + $0x18] sm:$0xff]  ;;  %v31_v14 = vld [vmem:[%s1045_s5 + $0x20] sm:$0xff] }
   0x6   :  { %709 = vmatprep.subr.msk.mxu0 %vm157_vm1, %v26_v4 }
   0x7   :  { %77 = vperm.xlu1 %814, %v30_v11  }
   0x8   :  { %67 = vperm.xlu0 %813, %v28_v10  }
   0x9   :  { %710 = vmatpush3.msk.msra.mxu0 %vm157_vm1, %v26_v4 }
   0xa   :  { %712 = vmatmul.mubr.msk.f32.vlgmr.msra.gmra.mrb[0].mxu0 %vm120_vm0, %v49_v8 }
   0xb   :  { %714 = vmatprep.mubr.msk.f32.mxu0 %vm120_vm0, %v50_v9 }
   0xc   :  { %11 = vsyncpa [#allocation3], 0  ;;  %v53_v16 = vld [vmem:[%s1041_s1 + $0x28] sm:$0xff]  ;;  %82 = vperm.xlu0 %813, %v31_v14   ;;  %v54_v17 = vld [vmem:[%s1041_s1 + $0x30] sm:$0xff]  ;;  %87 = vperm.xlu1 %814, %v32_v15   ;;  %vm322_vm2 = vcmask 523264   ;;  %vm428_vm3 = vcmask 261120  }
   0xd   :  { %v33_v18 = vld [vmem:[%s1045_s5 + $0x30] sm:$0xff]  ;;  %v34_v19 = vld [vmem:[%s1045_s5 + $0x38] sm:$0xff]  ;;  %v56_v21 = vld [vmem:[%s1041_s1 + $0x40] sm:$0xff] }
   0xe   :  { %715 = vmatmul.mubr.msk.f32.gmra.mrb[2].mxu0 %vm120_vm0, %v51_v12  ;;  %v55_v20 = vld [vmem:[%s1041_s1 + $0x38] sm:$0xff]  ;;  %v35_v22 = vld [vmem:[%s1045_s5 + $0x40] sm:$0xff]  ;;  %v36_v23 = vld [vmem:[%s1045_s5 + $0x48] sm:$0xff] }
   0xf   :  { %717 = vmatprep.mubr.msk.f32.mxu0 %vm120_vm0, %v52_v13  ;;  %v57_v24 = vld [vmem:[%s1041_s1 + $0x48] sm:$0xff]  ;;  %v58_v25 = vld [vmem:[%s1041_s1 + $0x50] sm:$0xff]  ;;  %v39_v26 = vld [vmem:[%s1045_s5 + $0x60] sm:$0xff] }
  0x10   :  { %92 = vperm.xlu0 %813, %v33_v18   ;;  %97 = vperm.xlu1 %814, %v34_v19   ;;  %v40_v27 = vld [vmem:[%s1045_s5 + $0x68] sm:$0xff]  ;;  %v59_v28 = vld [vmem:[%s1041_s1 + $0x58] sm:$0xff]  ;;  %v37_v29 = vld [vmem:[%s1045_s5 + $0x50] sm:$0xff] }
  0x11   :  { %v38_v30 = vld [vmem:[%s1045_s5 + $0x58] sm:$0xff]  ;;  %v41_v31 = vld [vmem:[%s1045_s5 + $0x70] sm:$0xff]  ;;  %v43_v33 = vld [vmem:[%s1045_s5 + $0x80] sm:$0xff] }
  0x12   :  { %718 = vmatmul.mubr.msk.f32.gmra.mrb[4].mxu0 %vm120_vm0, %v53_v16  ;;  %v42_v32 = vld [vmem:[%s1045_s5 + $0x78] sm:$0xff]  ;;  %v44_v34 = vld [vmem:[%s1045_s5 + $0x88] sm:$0xff]  ;;  %v45_v35 = vld [vmem:[%s1045_s5 + $0x90] sm:$0xff] }
  0x13   :  { %720 = vmatprep.mubr.msk.f32.mxu0 %vm120_vm0, %v54_v17  ;;  %v46_v36 = vld [vmem:[%s1045_s5 + $0x98] sm:$0xff]  ;;  %v47_v37 = vld [vmem:[%s1045_s5 + $0xa0] sm:$0x1] }
  0x14   :  { %102 = vperm.xlu0 %813, %v35_v22   ;;  %107 = vperm.xlu1 %814, %v36_v23   ;;  %v298_v38 = vld [vmem:[%s1042_s2] sm:$0xff] }
  0x15   :  { %745 = vmatprep.mubr.msk.f32.mxu1 %vm322_vm2, %v298_v38 }
  0x16   :  { %721 = vmatmul.mubr.msk.f32.gmra.mrb[6].mxu0 %vm120_vm0, %v55_v20 }
  0x17   :  { %723 = vmatprep.mubr.msk.f32.mxu0 %vm120_vm0, %v56_v21 }
  0x18   :  { %304 = vperm.xlu0 %813, %v39_v26   ;;  %309 = vperm.xlu1 %814, %v40_v27   ;;  %v299_v26 = vld [vmem:[%s1042_s2 + $0x8] sm:$0xff] }
  0x1a   :  { %724 = vmatmul.mubr.msk.f32.gmra.mrb[8].mxu0 %vm120_vm0, %v57_v24 }
  0x1b   :  { %726 = vmatprep.mubr.msk.f32.mxu0 %vm120_vm0, %v58_v25 }
  0x1c   :  { %112 = vperm.xlu0 %813, %v37_v29   ;;  %117 = vperm.xlu1 %814, %v38_v30   ;;  %v300_v29 = vld [vmem:[%s1042_s2 + $0x10] sm:$0xff] }
  0x1e   :  { %727 = vmatmul.mubr.msk.f32.gmra.mrb[10].mxu0 %vm120_vm0, %v59_v28 }
  0x20   :  { %314 = vperm.xlu0 %813, %v41_v31   ;;  %319 = vperm.xlu1 %814, %v42_v32   ;;  %v301_v32 = vld [vmem:[%s1042_s2 + $0x18] sm:$0xff] }
  0x24   :  { %593 = vperm.xlu0 %813, %v43_v33   ;;  %598 = vperm.xlu1 %814, %v44_v34   ;;  %v426_v34 = vld [vmem:[%s1044_s4] sm:$0xff] }
  0x25   :  { %759 = vmatprep.mubr.msk.f32.mxu0 %vm428_vm3, %v426_v34 }
  0x28   :  { %607 = vperm.xlu0 %813, %v45_v35   ;;  %612 = vperm.xlu1 %814, %v46_v36   ;;  %v424_v35 = vld [vmem:[%s1043_s3] sm:$0xff]  ;;  %v427_v36 = vld [vmem:[%s1044_s4 + $0x8] sm:$0xff] }
  0x2c   :  { %626 = vperm.xlu0 %813, %v47_v37  }
  0x82   :  { %v73_v39 = vpop.permute.xlu1 %72 }
  0x83   :  { %v63_v40 = vpop.permute.xlu0 %62 }
  0x86   :  { %v78_v41 = vpop.permute.xlu1 %77 }
  0x87   :  { %v68_v42 = vpop.permute.xlu0 %67 }
  0x8b   :  { %v88_v43 = vpop.permute.xlu1 %87  ;;  %v83_v44 = vpop.permute.xlu0 %82 }
  0x8f   :  { %v98_v48 = vpop.permute.xlu1 %97  ;;  %v93_v50 = vpop.permute.xlu0 %92 }
  0x93   :  { %v108_v59 = vpop.permute.xlu1 %107  ;;  %v103_v62 = vpop.permute.xlu0 %102 }
  0x97   :  { %v310_v8 = vpop.permute.xlu1 %309  ;;  %v305_v11 = vpop.permute.xlu0 %304 }
  0x9b   :  { %v118_v20 = vpop.permute.xlu1 %117  ;;  %v113_v23 = vpop.permute.xlu0 %112 }
  0xdd   :  { %v713_v45 = vpop.f32.mrb[0].mxu0 }
  0xde   :  { %v233_v46 = vadd.f32 %v713_v45, %v68_v42  ;;  %v227_v47 = vpop.f32.mrb[1].mxu0  ;;  %v320_v42 = vpop.permute.xlu1 %319 }
  0xdf   :  { %v228_v49 = vadd.f32 %v227_v47, %v63_v40  ;;  %v315_v45 = vpop.permute.xlu0 %314 }
  0xe0   :  { %v287_v51 = vmax.f32 %v233_v46, 0.0 }
  0xe1   :  { %v286_v52 = vmax.f32 %v228_v49, 0.0  ;;  %v716_v53 = vpop.f32.mrb[2].mxu0 }
  0xe2   :  { %v243_v54 = vadd.f32 %v716_v53, %v78_v41  ;;  %v237_v55 = vpop.f32.mrb[3].mxu0  ;;  %v425_v53 = vld [vmem:[%s1043_s3 + $0x8] sm:$0xff]  ;;  %s840_s3 = smov [#allocation2]  }
  0xe3   :  { %v238_v56 = vadd.f32 %v237_v55, %v73_v39  ;;  %v777_v57 = vpack.c.bf16 %v287_v51, %v286_v52  ;;  %s637_s30 = sshll.u32 %s840_s3, 4  ;;  %s638_s30 = int_to_ptr.vmem [resolvable:$true] %s637_s30 }
  0xe4   :  { %v289_v58 = vmax.f32 %v243_v54, 0.0  ;;  %s815_s7 = scalar_lea.vmem %s638_s30, 16  ;;  %s819_s1 = scalar_lea.vmem %s638_s30, 32 }
  0xe5   :  { %v288_v60 = vmax.f32 %v238_v56, 0.0  ;;  %v719_v61 = vpop.f32.mrb[4].mxu0  ;;  %778 = vmatprep.subr.bf16.mxu1 %v777_v57  ;;  %v599_v56 = vpop.permute.xlu1 %598  ;;  %p816_p0 = scmp.ne.s32.totalorder %s638_s30, %s815_s7  ;;  %p820_p1 = scmp.lt.s32.totalorder %s638_s30, %s638_s30 }
  0xe6   :  { %v253_v63 = vadd.f32 %v719_v61, %v88_v43  ;;  %v247_v0 = vpop.f32.mrb[5].mxu0  ;;  %780 = vmatpush3.bf16.msra.mxu1 %v777_v57  ;;  %p821_p2 = scmp.lt.s32.totalorder %s819_s1, %s815_s7 }
  0xe7   :  { %v781_v1 = vpack.c.bf16 %v289_v58, %v288_v60  ;;  %v248_v2 = vadd.f32 %v247_v0, %v83_v44  ;;  %v594_v58 = vpop.permute.xlu0 %593 }
  0xe8   :  { %v291_v3 = vmax.f32 %v253_v63, 0.0  ;;  %p822_p3 = por %p821_p2, %p820_p1 }
  0xe9   :  { %v290_v4 = vmax.f32 %v248_v2, 0.0  ;;  %v722_v5 = vpop.f32.mrb[6].mxu0  ;;  %782 = vmatprep.subr.bf16.mxu1 %v781_v1 }
  0xea   :  { %v263_v6 = vadd.f32 %v722_v5, %v98_v48  ;;  %v257_v7 = vpop.f32.mrb[7].mxu0  ;;  %784 = vmatpush3.bf16.msra.mxu1 %v781_v1  ;;  %v613_v1 = vpop.permute.xlu1 %612  ;;  %p823_p4 = pnand %p822_p3, %p816_p0 }
  0xeb   :  { %v785_v9 = vpack.c.bf16 %v291_v3, %v290_v4  ;;  %v258_v10 = vadd.f32 %v257_v7, %v93_v50  ;;  %v608_v3 = vpop.permute.xlu0 %607 }
  0xec   :  { %v293_v12 = vmax.f32 %v263_v6, 0.0 }
  0xed   :  { %v292_v13 = vmax.f32 %v258_v10, 0.0  ;;  %v725_v14 = vpop.f32.mrb[8].mxu0  ;;  %786 = vmatprep.subr.bf16.mxu1 %v785_v9 }
  0xee   :  { %v273_v15 = vadd.f32 %v725_v14, %v108_v59  ;;  %v267_v16 = vpop.f32.mrb[9].mxu0  ;;  %788 = vmatpush3.bf16.msra.mxu1 %v785_v9 }
  0xef   :  { %v789_v17 = vpack.c.bf16 %v293_v12, %v292_v13  ;;  %v268_v18 = vadd.f32 %v267_v16, %v103_v62  ;;  %v627_v13 = vpop.permute.xlu0 %626 }
  0xf0   :  { %v295_v19 = vmax.f32 %v273_v15, 0.0 }
  0xf1   :  { %v294_v21 = vmax.f32 %v268_v18, 0.0  ;;  %v728_v22 = vpop.f32.mrb[10].mxu0  ;;  %790 = vmatprep.subr.bf16.mxu1 %v789_v17 }
  0xf2   :  { %v283_v24 = vadd.f32 %v728_v22, %v118_v20  ;;  %v277_v25 = vpop.f32.mrb[11].mxu0  ;;  %792 = vmatpush3.bf16.msra.mxu1 %v789_v17 }
  0xf3   :  { %v793_v27 = vpack.c.bf16 %v295_v19, %v294_v21  ;;  %v278_v28 = vadd.f32 %v277_v25, %v113_v23 }
  0xf4   :  { %v297_v30 = vmax.f32 %v283_v24, 0.0 }
  0xf5   :  { %v296_v31 = vmax.f32 %v278_v28, 0.0  ;;  %746 = vmatmul.mubr.msk.f32.vlgmr.msra.gmra.mrb[0].mxu1 %vm322_vm2, %v299_v26  ;;  %794 = vmatprep.subr.bf16.mxu0 %v793_v27 }
  0xf6   :  { %796 = vmatpush3.bf16.msra.mxu0 %v793_v27  ;;  %748 = vmatprep.mubr.msk.f32.mxu1 %vm322_vm2, %v300_v29 }
  0xf7   :  { %v797_v33 = vpack.c.bf16 %v297_v30, %v296_v31 }
  0xf9   :  { %749 = vmatmul.mubr.msk.f32.gmra.mrb[2].mxu1 %vm322_vm2, %v301_v32  ;;  %798 = vmatprep.subr.bf16.mxu0 %v797_v33 }
  0xfa   :  { %800 = vmatpush3.bf16.msra.mxu0 %v797_v33  ;;  %770 = vmatprep.mubr.msk.f32.mxu1 %vm428_vm3, %v424_v35 }
  0xfd   :  { %760 = vmatmul.mubr.msk.f32.vlgmr.msra.gmra.mrb[12].mxu0 %vm428_vm3, %v427_v36 }
 0x1c8   :  { %v747_v37 = vpop.f32.mrb[0].mxu1 }
 0x1c9   :  { %v407_v38 = vadd.f32 %v747_v37, %v310_v8  ;;  %v401_v39 = vpop.f32.mrb[1].mxu1 }
 0x1ca   :  { %v402_v40 = vadd.f32 %v401_v39, %v305_v11 }
 0x1cb   :  { %v421_v41 = vmax.f32 %v407_v38, 0.0 }
 0x1cc   :  { %v420_v43 = vmax.f32 %v402_v40, 0.0  ;;  %v750_v44 = vpop.f32.mrb[2].mxu1 }
 0x1cd   :  { %v417_v46 = vadd.f32 %v750_v44, %v320_v42  ;;  %v411_v47 = vpop.f32.mrb[3].mxu1 }
 0x1ce   :  { %v801_v48 = vpack.c.bf16 %v421_v41, %v420_v43  ;;  %v412_v49 = vadd.f32 %v411_v47, %v315_v45 }
 0x1cf   :  { %v423_v50 = vmax.f32 %v417_v46, 0.0 }
 0x1d0   :  { %v422_v51 = vmax.f32 %v412_v49, 0.0  ;;  %802 = vmatprep.subr.bf16.mxu1 %v801_v48  ;;  %v761_v54 = vpop.f32.mrb[12].mxu0 }
 0x1d1   :  { %804 = vmatpush3.bf16.msra.mxu1 %v801_v48  ;;  %v501_v55 = vpop.f32.mrb[13].mxu0 }
 0x1d2   :  { %v805_v52 = vpack.c.bf16 %v423_v50, %v422_v51 }
 0x1d4   :  { %806 = vmatprep.subr.bf16.mxu1 %v805_v52 }
 0x1d5   :  { %808 = vmatpush3.bf16.msra.mxu1 %v805_v52 }
 0x1d8   :  { %771 = vmatmul.mubr.msk.f32.vlgmr.msra.gmra.mrb[4].mxu1 %vm428_vm3, %v425_v53 }
 0x2ab   :  { %v772_v57 = vpop.f32.mrb[4].mxu1 }
 0x2ac   :  { %v588_v59 = vadd.f32 %v772_v57, %v761_v54  ;;  %v582_v60 = vpop.f32.mrb[5].mxu1 }
 0x2ad   :  { %v583_v61 = vadd.f32 %v582_v60, %v501_v55 }
 0x2ae   :  { %v602_v62 = vadd.f32 %v599_v56, %v588_v59 }
 0x2af   :  { %v601_v63 = vadd.f32 %v594_v58, %v583_v61 }
 0x2b0   :  { %v604_v0 = vmax.f32 %v602_v62, 0.0 }
 0x2b1   :  { %v603_v2 = vmax.f32 %v601_v63, 0.0 }
 0x2b2   :  { %v616_v4 = vmul.f32 %v613_v1, %v604_v0 }
 0x2b3   :  { %v615_v5 = vmul.f32 %v608_v3, %v603_v2 }
 0x2b5   :  { %v617_v6 = vadd.f32 %v616_v4, %v615_v5 }
 0x2b7   :  { %v618_v7 = vrot.slane %v617_v6, 4 }
 0x2b9   :  { %v619_v8 = vadd.f32 %v618_v7, %v617_v6 }
 0x2bb   :  { %v620_v9 = vrot.slane %v619_v8, 2 }
 0x2bd   :  { %v621_v10 = vadd.f32 %v620_v9, %v619_v8 }
 0x2bf   :  { %v622_v11 = vrot.slane %v621_v10, 1 }
 0x2c1   :  { %v623_v12 = vadd.f32 %v622_v11, %v621_v10 }
 0x2c3   :  { %v629_v14 = vadd.f32 %v627_v13, %v623_v12 }
 0x2c5   :  { %630 = vst [vmem:[#allocation2] sm:$0x1] %v629_v14 }
 0x2c6   :  { %826 = shalt.err (!%p823_p4)
}
 0x2c7   :  { %s827_s10 = scalar_lea.hbm %s1046_s6, 16 }
 0x2c8   :  { %p828_p5 = scmp.ne.s32.totalorder %s1046_s6, %s827_s10  ;;  %p831_p6 = scmp.lt.u32.totalorder %s827_s10, %s1046_s6 }
 0x2ca   :  { %p833_p7 = pnand %p831_p6, %p828_p5 }
 0x2cc   :  { %836 = shalt.err (!%p833_p7)
}
 0x2cd   :  { %640 = dma.vmem_to_hbm [thread:$0]  %s638_s30, 16, %s1046_s6, [#allocation3]  }
 0x2ce   :  { %837 = dma.done.wait [#allocation3], 16  }
 0x2cf   :  { %838 = vsyncadd [#allocation3], 4294967280 }
 0x2d0   :  { %644 = vsyncpa [#allocation3], 1 }

</bundles_post_ra>
